<compile_context>
chip_gen: v7x
topology: tpu7x:2x2x1
jax: 0.10.0
libtpu: 0.0.40
codegen_flags: <defaults>
</compile_context>

<pallas_src>
import functools
import math

import jax
import jax.numpy as jnp
from jax import lax
from jax.experimental import pallas as pl
from jax.experimental.pallas import tpu as pltpu


def _make_mlp_kernel(num_linear, compute_dtype):
    """Fused MLP kernel: (Linear -> Sigmoid) * (L-1) -> Linear, batch on lanes."""

    def kernel(x_ref, *refs):
        param_refs = refs[:-1]          # interleaved (w0, b0, w1, b1, ...)
        o_ref = refs[-1]

        # x_ref is a raw (T, D) row-slab of the original (f32) input; cast to the
        # MXU operand dtype in-register (no wrapper-side HBM pass).
        xb = x_ref[...].astype(compute_dtype)            # (T, D)

        # First layer: contract dim 1 of W (out, D) with dim 1 of xb (T, D)
        # -> (out, T): batch lands on the lane axis, output stays lane-dense.
        w0 = param_refs[0][...]                          # (out0, D) bf16, resident
        b0 = param_refs[1][...]                          # (out0, 1) f32, resident
        h = lax.dot_general(
            w0, xb,
            dimension_numbers=(((1,), (1,)), ((), ())),
            preferred_element_type=jnp.float32) + b0     # f32 accum + bias

        for i in range(1, num_linear):
            h = jax.nn.sigmoid(h)                        # f32 on the EUP
            h = h.astype(compute_dtype)                  # back to bf16 for the MXU
            w = param_refs[2 * i][...]                   # (out, in) bf16, resident
            b = param_refs[2 * i + 1][...]               # (out, 1) f32, resident
            h = jnp.dot(w, h, preferred_element_type=jnp.float32) + b

        o_ref[...] = h.astype(o_ref.dtype)               # (1, T) lane-dense store

    return kernel


def triplet_linear_classifier(x, params, *, batch_tile=2048,
                              compute_dtype=jnp.bfloat16):
    """Forward pass.

    Args:
      x: (B, D) input (any float dtype; read as-is, cast in-kernel).
      params: list of (W, b) per linear layer in PyTorch-native layout,
              W of shape (out, in), b of shape (out,).
      batch_tile: rows per grid step (rounded up to a multiple of 128 so the
                  per-step output block stays lane-dense). Main tuning knob.
      compute_dtype: MXU operand dtype (bf16 is native on v5e/v6e/v7x).

    Returns:
      (B,) logits in x.dtype.
    """
    B, D = x.shape
    num_linear = len(params)

    # Lane-dense output blocks: batch tile is a multiple of 128.
    batch_tile = max(128, ((batch_tile + 127) // 128) * 128)
    # v7x megacore: keep at least 2 grid steps (when B allows) so the "parallel"
    # batch axis can shard across the two TensorCores. Costs one extra ~0.35us
    # step on single-core v5e/v6e — negligible.
    if B > 128 and pl.cdiv(B, batch_tile) < 2:
        batch_tile = max(128, ((pl.cdiv(B, 2) + 127) // 128) * 128)
    num_tiles = pl.cdiv(B, batch_tile)   # ragged last block handled by Pallas

    in_specs = [pl.BlockSpec((batch_tile, D), lambda i: (i, 0))]
    flat_params = []
    for (w, b) in params:
        w_c = w.astype(compute_dtype)                   # cast ONCE here, resident
        b_c = b.reshape(-1, 1).astype(jnp.float32)      # (out, 1) f32 bias
        flat_params.extend([w_c, b_c])
        in_specs.append(pl.BlockSpec(w_c.shape, lambda i: (0, 0)))  # resident
        in_specs.append(pl.BlockSpec(b_c.shape, lambda i: (0, 0)))  # resident

    # Explicit VMEM budget (v5e scoped default is only 16 MiB; v7x physical 64 MiB).
    itemsize = jnp.dtype(x.dtype).itemsize
    weight_bytes = sum(w.size * jnp.dtype(compute_dtype).itemsize + b.size * 4
                       for (w, b) in params)
    io_bytes = 2 * (batch_tile * D * itemsize + batch_tile * itemsize)  # dbl-buffered
    scratch_bytes = batch_tile * D * 8          # bf16 copy + f32 intermediates (gen.)
    vmem_limit = int(min(64 << 20,
                         max(32 << 20, 2 * (weight_bytes + io_bytes + scratch_bytes))))

    kernel = _make_mlp_kernel(num_linear, compute_dtype)

    out = pl.pallas_call(
        kernel,
        out_shape=jax.ShapeDtypeStruct((1, B), x.dtype),
        grid_spec=pl.GridSpec(
            grid=(num_tiles,),
            in_specs=in_specs,
            out_specs=pl.BlockSpec((1, batch_tile), lambda i: (0, i)),
        ),
        compiler_params=pltpu.CompilerParams(
            # Batch axis is embarrassingly parallel (megacore-shardable on v7x).
            dimension_semantics=("parallel",),
            vmem_limit_bytes=vmem_limit,
        ),
    )(x, *flat_params)

    return out[0]                        # (B,), matches x.squeeze(-1)


def init_params(key, input_dim, num_layers=1, dtype=jnp.float32):
    """nn.Linear-style init U(-1/sqrt(fan_in), 1/sqrt(fan_in)); W is (out, in)."""
    params = []
    dims = []
    current = input_dim
    for _ in range(num_layers - 1):
        dims.append((current // 2, current))     # (out, in)
        current = current // 2
    dims.append((1, current))

    for (fan_out, fan_in) in dims:
        key, kw, kb = jax.random.split(key, 3)
        bound = 1.0 / math.sqrt(fan_in)
        w = jax.random.uniform(kw, (fan_out, fan_in), dtype, -bound, bound)
        b = jax.random.uniform(kb, (fan_out,), dtype, -bound, bound)
        params.append((w, b))
    return params


def _reference(x, params, compute_dtype=jnp.bfloat16):
    """Pure-JAX mirror of the kernel math (bf16 MXU operands, f32 accum/sigmoid)."""
    h = x.astype(compute_dtype).T
    for i, (w, b) in enumerate(params):
        h = jnp.dot(w.astype(compute_dtype), h, preferred_element_type=jnp.float32)
        h = h + b.reshape(-1, 1).astype(jnp.float32)
        if i < len(params) - 1:
            h = jax.nn.sigmoid(h).astype(compute_dtype)
    return h[0].astype(x.dtype)


if __name__ == "__main__":
    key = jax.random.PRNGKey(0)
    # Linear(32->16) -> Sigmoid -> Linear(16->8) -> Sigmoid -> Linear(8->1)
    B, INPUT_DIM, NUM_LAYERS = 300, 32, 3

    key, kx = jax.random.split(key)
    x = jax.random.normal(kx, (B, INPUT_DIM), jnp.float32)
    params = init_params(key, INPUT_DIM, NUM_LAYERS)

    # batch_tile=256 here so the small test exercises multi-step grid + a ragged
    # last block (2 grid steps, last block 44 valid rows). Production default is
    # 2048+ for large B.
    fn = jax.jit(functools.partial(triplet_linear_classifier, batch_tile=256))
    out = fn(x, params)
    jax.block_until_ready(out)
    assert out.shape == (B,), out.shape

    # Check against a pure-JAX mirror of the kernel's bf16/f32 mixed-precision math.
    ref = _reference(x, params)
    assert jnp.allclose(out, ref, atol=1e-2, rtol=1e-2), \
        float(jnp.max(jnp.abs(out - ref)))

    # Sanity check against the full-f32 PyTorch-style forward
    # (loose tol: bf16 operands; quantization error grows with fan-in).
    h = x
    for i, (w, b) in enumerate(params):
        h = h @ w.T + b
        if i < len(params) - 1:
            h = jax.nn.sigmoid(h)
    ref_f32 = h[:, 0]
    assert jnp.allclose(out, ref_f32, atol=1e-1, rtol=1e-1), \
        float(jnp.max(jnp.abs(out - ref_f32)))

    print("KERNEL_OK")
</pallas_src>

<mosaic_0001>
module attributes {stable_mosaic.version = 11 : i64} {
  func.func @kernel(%arg0: i32, %arg1: memref<256x32xf32, #tpu.memory_space<vmem>>, %arg2: memref<16x32xbf16, #tpu.memory_space<vmem>>, %arg3: memref<16x1xf32, #tpu.memory_space<vmem>>, %arg4: memref<8x16xbf16, #tpu.memory_space<vmem>>, %arg5: memref<8x1xf32, #tpu.memory_space<vmem>>, %arg6: memref<1x8xbf16, #tpu.memory_space<vmem>>, %arg7: memref<1x1xf32, #tpu.memory_space<vmem>>, %arg8: memref<1x256xf32, #tpu.memory_space<vmem>>) attributes {dimension_semantics = [#tpu.dimension_semantics<parallel>], iteration_bounds = array<i64: 2>, scalar_prefetch = 0 : i64, scratch_operands = 0 : i64, tpu.core_type = #tpu.core_type<tc>, window_params = [{transform_indices = @transform_0, window_bounds = array<i64: 256, 32>}, {pipeline_mode = #tpu.pipeline_mode<synchronous>, transform_indices = @transform_1, window_bounds = array<i64: 16, 32>}, {pipeline_mode = #tpu.pipeline_mode<synchronous>, transform_indices = @transform_2, window_bounds = array<i64: 16, 1>}, {pipeline_mode = #tpu.pipeline_mode<synchronous>, transform_indices = @transform_3, window_bounds = array<i64: 8, 16>}, {pipeline_mode = #tpu.pipeline_mode<synchronous>, transform_indices = @transform_4, window_bounds = array<i64: 8, 1>}, {pipeline_mode = #tpu.pipeline_mode<synchronous>, transform_indices = @transform_5, window_bounds = array<i64: 1, 8>}, {pipeline_mode = #tpu.pipeline_mode<synchronous>, transform_indices = @transform_6, window_bounds = array<i64: 1, 1>}, {transform_indices = @transform_7, window_bounds = array<i64: 1, 256>}]} {
    %c0 = arith.constant 0 : index
    %c0_0 = arith.constant 0 : index
    %0 = vector.load %arg1[%c0, %c0_0] : memref<256x32xf32, #tpu.memory_space<vmem>>, vector<256x32xf32>
    %1 = arith.truncf %0 : vector<256x32xf32> to vector<256x32xbf16>
    %c0_1 = arith.constant 0 : index
    %c0_2 = arith.constant 0 : index
    %2 = vector.load %arg2[%c0_1, %c0_2] : memref<16x32xbf16, #tpu.memory_space<vmem>>, vector<16x32xbf16>
    %c0_3 = arith.constant 0 : index
    %c0_4 = arith.constant 0 : index
    %3 = vector.load %arg3[%c0_3, %c0_4] : memref<16x1xf32, #tpu.memory_space<vmem>>, vector<16x1xf32>
    %cst = arith.constant dense<0.000000e+00> : vector<16x256xf32>
    %4 = tpu.matmul %2, %1, %cst {dimension_numbers = #tpu.dot_dimension_numbers<[1], [1], [0], [0], [0, 0, 1, 0], [], []>} : vector<16x32xbf16>, vector<256x32xbf16>, vector<16x256xf32> -> vector<16x256xf32>
    %5 = vector.broadcast %3 : vector<16x1xf32> to vector<16x256xf32>
    %6 = arith.addf %4, %5 : vector<16x256xf32>
    %7 = arith.negf %6 : vector<16x256xf32>
    %8 = math.exp %7 : vector<16x256xf32>
    %cst_5 = arith.constant 1.000000e+00 : f32
    %9 = vector.broadcast %cst_5 : f32 to vector<16x256xf32>
    %10 = arith.addf %9, %8 : vector<16x256xf32>
    %11 = arith.divf %9, %10 : vector<16x256xf32>
    %12 = arith.truncf %11 : vector<16x256xf32> to vector<16x256xbf16>
    %c0_6 = arith.constant 0 : index
    %c0_7 = arith.constant 0 : index
    %13 = vector.load %arg4[%c0_6, %c0_7] : memref<8x16xbf16, #tpu.memory_space<vmem>>, vector<8x16xbf16>
    %c0_8 = arith.constant 0 : index
    %c0_9 = arith.constant 0 : index
    %14 = vector.load %arg5[%c0_8, %c0_9] : memref<8x1xf32, #tpu.memory_space<vmem>>, vector<8x1xf32>
    %cst_10 = arith.constant dense<0.000000e+00> : vector<8x256xf32>
    %15 = tpu.matmul %13, %12, %cst_10 {dimension_numbers = #tpu.dot_dimension_numbers<[1], [0], [0], [1], [0, 0, 1, 1], [], []>} : vector<8x16xbf16>, vector<16x256xbf16>, vector<8x256xf32> -> vector<8x256xf32>
    %16 = vector.broadcast %14 : vector<8x1xf32> to vector<8x256xf32>
    %17 = arith.addf %15, %16 : vector<8x256xf32>
    %18 = arith.negf %17 : vector<8x256xf32>
    %19 = math.exp %18 : vector<8x256xf32>
    %cst_11 = arith.constant 1.000000e+00 : f32
    %20 = vector.broadcast %cst_11 : f32 to vector<8x256xf32>
    %21 = arith.addf %20, %19 : vector<8x256xf32>
    %22 = arith.divf %20, %21 : vector<8x256xf32>
    %23 = arith.truncf %22 : vector<8x256xf32> to vector<8x256xbf16>
    %c0_12 = arith.constant 0 : index
    %c0_13 = arith.constant 0 : index
    %24 = vector.load %arg6[%c0_12, %c0_13] : memref<1x8xbf16, #tpu.memory_space<vmem>>, vector<1x8xbf16>
    %c0_14 = arith.constant 0 : index
    %c0_15 = arith.constant 0 : index
    %25 = vector.load %arg7[%c0_14, %c0_15] : memref<1x1xf32, #tpu.memory_space<vmem>>, vector<1x1xf32>
    %cst_16 = arith.constant dense<0.000000e+00> : vector<1x256xf32>
    %26 = tpu.matmul %24, %23, %cst_16 {dimension_numbers = #tpu.dot_dimension_numbers<[1], [0], [0], [1], [0, 0, 1, 1], [], []>} : vector<1x8xbf16>, vector<8x256xbf16>, vector<1x256xf32> -> vector<1x256xf32>
    %27 = vector.broadcast %25 : vector<1x1xf32> to vector<1x256xf32>
    %28 = arith.addf %26, %27 : vector<1x256xf32>
    %c0_17 = arith.constant 0 : index
    %c0_18 = arith.constant 0 : index
    %29 = vector.load %arg8[%c0_17, %c0_18] : memref<1x256xf32, #tpu.memory_space<vmem>>, vector<1x256xf32>
    tpu.vector_store %arg8[%c0_17, %c0_18], %28 {strides = array<i32>} : memref<1x256xf32, #tpu.memory_space<vmem>>, vector<1x256xf32>,
    return
  }
  func.func @transform_0(%arg0: i32) -> (i32, i32) {
    %c0_i32 = arith.constant 0 : i32
    %c0_i32_0 = arith.constant 0 : i32
    return %arg0, %c0_i32 : i32, i32
  }
  func.func @transform_1(%arg0: i32) -> (i32, i32) {
    %c0_i32 = arith.constant 0 : i32
    %c0_i32_0 = arith.constant 0 : i32
    %c0_i32_1 = arith.constant 0 : i32
    return %c0_i32, %c0_i32_0 : i32, i32
  }
  func.func @transform_2(%arg0: i32) -> (i32, i32) {
    %c0_i32 = arith.constant 0 : i32
    %c0_i32_0 = arith.constant 0 : i32
    %c0_i32_1 = arith.constant 0 : i32
    return %c0_i32, %c0_i32_0 : i32, i32
  }
  func.func @transform_3(%arg0: i32) -> (i32, i32) {
    %c0_i32 = arith.constant 0 : i32
    %c0_i32_0 = arith.constant 0 : i32
    %c0_i32_1 = arith.constant 0 : i32
    return %c0_i32, %c0_i32_0 : i32, i32
  }
  func.func @transform_4(%arg0: i32) -> (i32, i32) {
    %c0_i32 = arith.constant 0 : i32
    %c0_i32_0 = arith.constant 0 : i32
    %c0_i32_1 = arith.constant 0 : i32
    return %c0_i32, %c0_i32_0 : i32, i32
  }
  func.func @transform_5(%arg0: i32) -> (i32, i32) {
    %c0_i32 = arith.constant 0 : i32
    %c0_i32_0 = arith.constant 0 : i32
    %c0_i32_1 = arith.constant 0 : i32
    return %c0_i32, %c0_i32_0 : i32, i32
  }
  func.func @transform_6(%arg0: i32) -> (i32, i32) {
    %c0_i32 = arith.constant 0 : i32
    %c0_i32_0 = arith.constant 0 : i32
    %c0_i32_1 = arith.constant 0 : i32
    return %c0_i32, %c0_i32_0 : i32, i32
  }
  func.func @transform_7(%arg0: i32) -> (i32, i32) {
    %c0_i32 = arith.constant 0 : i32
    %c0_i32_0 = arith.constant 0 : i32
    return %c0_i32, %arg0 : i32, i32
  }
}

</mosaic_0001>

<bundles_post_ra>
// kernel: triplet_linear_classifier.1
= control target key start
LH: loop header
LB: loop body
LE: loop exit
PB: predicated region body
PF: predicated region fallthrough
CT: control target
= control target key end

     0   :  { %s2184_s0 = inlined_call_operand.vmem [shape: f32[300,32], index: 0, kind: input, shape index: {}]   ;;  %s2185_s1 = inlined_call_operand.vmem [shape: bf16[16,32], index: 1, kind: input, shape index: {}]   ;;  %s2186_s2 = inlined_call_operand.vmem [shape: f32[16,1], index: 2, kind: input, shape index: {}]   ;;  %s2187_s3 = inlined_call_operand.vmem [shape: bf16[8,16], index: 3, kind: input, shape index: {}]   ;;  %s2188_s4 = inlined_call_operand.vmem [shape: f32[8,1], index: 4, kind: input, shape index: {}]   ;;  %s2189_s5 = inlined_call_operand.vmem [shape: bf16[1,8], index: 5, kind: input, shape index: {}]   ;;  %s2190_s6 = inlined_call_operand.<no memory space> [shape: f32[1,1], index: 6, kind: input, shape index: {}]   ;;  %s2191_s7 = inlined_call_operand.vmem [shape: f32[1,300], index: 7, kind: output, shape index: {}]  }
   0x1   :  { %v12_v0 = vstv %s2190_s6 }
   0x2   :  { %13 = vst [vmem:[#allocation2] sm:$0x1] %v12_v0 }
   0x3   :  { %s1647_s26 = smov 0   ;;  %s1649_s27 = smov 0  }
   0x4   :  { %s1651_s28 = smov 0  }
   0x5 LB: > { %s1660_s6 = sadd.s32 4294967295, %s1534_s28   ;;  %s1662_s29 = sadd.s32 1, %s1534_s28   ;;  %s1534_s28 = sphi %s1651_s28, %s2205_s28   ;;  %s1530_s27 = sphi %s1649_s27, %s2204_s27   ;;  %s1526_s26 = sphi %s1647_s26, %s2203_s26  }
   0x6   : > { %s175_s30 = ssub.s32 %s1534_s28, %s1662_s29  ;;  %s178_s8 = sadd.s32 1, %s1530_s27 }
   0x7   : > { %p176_p0 = scmp.eq.s32.totalorder %s175_s30, 0  ;;  %p188_p1 = scmp.ne.s32.totalorder %s1530_s27, %s1526_s26 }
   0x8   : > { %p189_p2 = scmp.eq.s32.totalorder %s1660_s6, 1  ;;  %p1193_p3 = scmp.ge.s32.totalorder %s1534_s28, 1 }
   0x9   : > { %s1670_s9 = scalar_select %p176_p0, %s1530_s27, %s178_s8  }
   0xa   : > { %p1672_p4 = por %p189_p2, %p188_p1  ;;  %p248_p5 = scmp.lt.s32.totalorder %s1534_s28, 3 }
   0xc   : > { %p249_p6 = pnand %p1193_p3, %p248_p5 }
   0xd   : > { %s1195_s11 = sshll.u32 (!%p249_p6), %s1660_s6, 5  ;;  %v1680_v1 = vld [vmem:[%s2185_s1] sm:$0xff] (!%p249_p6)   ;;  %vm370_vm0 = vcmask (!%p249_p6), 261120   ;;  %v1600_v3 = vmov (!%p249_p6), 0   ;;  %v354_v4 = vld [vmem:[%s2186_s2 + $0x8] sm:$0xff] (!%p249_p6)  ;;  %vm498_vm1 = vcmask (!%p249_p6), 130048  }
   0xe   : > { %252 = sbr.rel (%p249_p6) target bundleno = 975 (0x3cf), region = 48  ;;  %p288_p7 = scmp.lt.s32.totalorder (!%p249_p6), %s1195_s11, 37  ;;  %v353_v2 = vld [vmem:[%s2186_s2] sm:$0xff] (!%p249_p6)  ;;  %1421 = vset.pattern.permute.xlu0 (!%p249_p6), %v1600_v3  ;;  %534 = vmatprep.mubr.bf16.mxu1 (!%p249_p6), %v1600_v3  ;;  %vm572_vm2 = vcmask (!%p249_p6), 1043456   ;;  %vm568_vm3 = vcmask (!%p249_p6), 64512  }
   0xf   : > { %1255 = vmatprep.mubr.msk.bf16.mxu0 (!%p249_p6), %vm370_vm0, %v1680_v1  ;;  %357 = vperm.xlu0 (!%p249_p6), %1421, %v353_v2   ;;  %v492_v61 = vld [vmem:[%s2188_s4] sm:$0xff] (!%p249_p6)  ;;  %s280_s8 = sand.u32 (!%p249_p6), 1, %s1526_s26  }
  0x10   : > { %1422 = vset.pattern.permute.xlu1 (!%p249_p6), %v1600_v3  ;;  %v558_v62 = vld [vmem:[#allocation2] sm:$0x1] (!%p249_p6) }
  0x11   : > { %495 = vperm.xlu1 (!%p249_p6), %1422, %v492_v61  }
  0x13   : > { %362 = vperm.xlu0 (!%p249_p6), %1421, %v354_v4  }
  0x15   : > { %s2207_s11 = smov (!%p288_p7, %s1195_s11), 37  ;;  %561 = vperm.xlu1 %1422, %v558_v62   ;;  %s1209_s13 = sshll.u32 (%p1672_p4), %s1660_s6, 1 }
  0x16   : > { %s1196_s18 = sshll.u32 %s2207_s11, 3  ;;  %s1194_s11 = sshll.u32 %s280_s8, 1 }
  0x17   : > { %s1696_s21 = scalar_lea.vmem %s2184_s0, %s1196_s18  ;;  %s1759_s12 = scalar_lea.vmem [#allocation3], %s1194_s11  }
  0x18   : > { %v319_v5 = vld [vmem:[%s1696_s21 + $0x80] sm:$0xff]  ;;  %v320_v6 = vld [vmem:[%s1696_s21 + $0x88] sm:$0xff]  ;;  %v321_v10 = vld [vmem:[%s1696_s21 + $0x90] sm:$0xff]  ;;  %s651_s26 = ssub.s32 (%p1672_p4), 3, %s1209_s13  ;;  %s1768_s16 = scalar_lea.vmem (%p1672_p4), %s2191_s7, %s1209_s13  }
  0x19   : > { %v303_v7 = vld [vmem:[%s1696_s21] sm:$0xff]  ;;  %v343_v8 = vpack.c.bf16 %v320_v6, %v319_v5  ;;  %v304_v9 = vld [vmem:[%s1696_s21 + $0x8] sm:$0xff]  ;;  %v322_v11 = vld [vmem:[%s1696_s21 + $0x98] sm:$0xff]  ;;  %p652_p8 = scmp.lt.s32.totalorder (%p1672_p4), %s651_s26, 2 }
  0x1a   : > { %v335_v12 = vpack.c.bf16 %v304_v9, %v303_v7  ;;  %v344_v13 = vpack.c.bf16 %v322_v11, %v321_v10  ;;  %v305_v14 = vld [vmem:[%s1696_s21 + $0x10] sm:$0xff]  ;;  %v306_v15 = vld [vmem:[%s1696_s21 + $0x18] sm:$0xff]  ;;  %v323_v18 = vld [vmem:[%s1696_s21 + $0xa0] sm:$0xff] }
  0x1b   : > { %1257 = vmatprep.subr.msk.bf16.mxu0 %vm370_vm0, %v343_v8  ;;  %v336_v17 = vpack.c.bf16 %v306_v15, %v305_v14  ;;  %v324_v19 = vld [vmem:[%s1696_s21 + $0xa8] sm:$0xff]  ;;  %v307_v22 = vld [vmem:[%s1696_s21 + $0x20] sm:$0xff]  ;;  %v325_v25 = vld [vmem:[%s1696_s21 + $0xb0] sm:$0xff] }
  0x1c   : > { %v375_v16 = vsel %vm370_vm0, %v335_v12, 0  ;;  %v345_v21 = vpack.c.bf16 %v324_v19, %v323_v18  ;;  %v308_v23 = vld [vmem:[%s1696_s21 + $0x28] sm:$0xff]  ;;  %v326_v26 = vld [vmem:[%s1696_s21 + $0xb8] sm:$0xff]  ;;  %v309_v29 = vld [vmem:[%s1696_s21 + $0x30] sm:$0xff] }
  0x1d   : > { %1240 = vmatpush3.bf16.xpose.msra.mxu0 %v375_v16  ;;  %v378_v20 = vsel %vm370_vm0, %v336_v17, 0  ;;  %v337_v24 = vpack.c.bf16 %v308_v23, %v307_v22  ;;  %v346_v28 = vpack.c.bf16 %v326_v26, %v325_v25  ;;  %v310_v30 = vld [vmem:[%s1696_s21 + $0x38] sm:$0xff]  ;;  %v327_v32 = vld [vmem:[%s1696_s21 + $0xc0] sm:$0xff]  ;;  %v328_v33 = vld [vmem:[%s1696_s21 + $0xc8] sm:$0xff] }
  0x1e   : > { %1258 = vmatprep.subr.msk.bf16.mxu0 %vm370_vm0, %v344_v13  ;;  %v338_v31 = vpack.c.bf16 %v310_v30, %v309_v29  ;;  %v347_v35 = vpack.c.bf16 %v328_v33, %v327_v32  ;;  %v311_v36 = vld [vmem:[%s1696_s21 + $0x40] sm:$0xff]  ;;  %v312_v37 = vld [vmem:[%s1696_s21 + $0x48] sm:$0xff]  ;;  %v329_v39 = vld [vmem:[%s1696_s21 + $0xd0] sm:$0xff] }
  0x1f   : > { %v381_v27 = vsel %vm370_vm0, %v337_v24, 0  ;;  %v339_v38 = vpack.c.bf16 %v312_v37, %v311_v36  ;;  %v330_v40 = vld [vmem:[%s1696_s21 + $0xd8] sm:$0xff]  ;;  %v313_v43 = vld [vmem:[%s1696_s21 + $0x50] sm:$0xff]  ;;  %v331_v46 = vld [vmem:[%s1696_s21 + $0xe0] sm:$0xff] }
  0x20   : > { %v384_v34 = vsel %vm370_vm0, %v338_v31, 0  ;;  %v348_v42 = vpack.c.bf16 %v330_v40, %v329_v39  ;;  %v314_v44 = vld [vmem:[%s1696_s21 + $0x58] sm:$0xff]  ;;  %v332_v47 = vld [vmem:[%s1696_s21 + $0xe8] sm:$0xff]  ;;  %v315_v50 = vld [vmem:[%s1696_s21 + $0x60] sm:$0xff] }
  0x21   : > { %v387_v41 = vsel %vm370_vm0, %v339_v38, 0  ;;  %v340_v45 = vpack.c.bf16 %v314_v44, %v313_v43  ;;  %v349_v49 = vpack.c.bf16 %v332_v47, %v331_v46  ;;  %v316_v51 = vld [vmem:[%s1696_s21 + $0x68] sm:$0xff]  ;;  %v333_v53 = vld [vmem:[%s1696_s21 + $0xf0] sm:$0xff]  ;;  %v334_v54 = vld [vmem:[%s1696_s21 + $0xf8] sm:$0xff]  ;;  %v564_v47 = vlaneseq }
  0x22   : > { %v341_v52 = vpack.c.bf16 %v316_v51, %v315_v50  ;;  %v350_v56 = vpack.c.bf16 %v334_v54, %v333_v53  ;;  %v317_v57 = vld [vmem:[%s1696_s21 + $0x70] sm:$0xff]  ;;  %v318_v58 = vld [vmem:[%s1696_s21 + $0x78] sm:$0xff]  ;;  %v557_v46 = vld [vmem:[%s2189_s5] sm:$0x1] }
  0x23   : > { %v390_v48 = vsel %vm370_vm0, %v340_v45, 0  ;;  %v342_v59 = vpack.c.bf16 %v318_v58, %v317_v57  ;;  %vm640_vm4 = vcmp.lt.s32.totalorder %v564_v47, 256 }
  0x24   : > { %v393_v55 = vsel %vm370_vm0, %v341_v52, 0 }
  0x25   : > { %1242 = vmatpush3.bf16.xpose.msra.mxu0 %v378_v20  ;;  %v396_v60 = vsel %vm370_vm0, %v342_v59, 0 }
  0x26   : > { %1259 = vmatprep.subr.msk.bf16.mxu0 %vm370_vm0, %v345_v21 }
  0x2d   : > { %1244 = vmatpush3.bf16.xpose.msra.mxu0 %v381_v27 }
  0x2e   : > { %1260 = vmatprep.subr.msk.bf16.mxu0 %vm370_vm0, %v346_v28  ;;  %v491_v28 = vld [vmem:[%s2187_s3] sm:$0xf] }
  0x35   : > { %1246 = vmatpush3.bf16.xpose.msra.mxu0 %v384_v34 }
  0x36   : > { %1261 = vmatprep.subr.msk.bf16.mxu0 %vm370_vm0, %v347_v35 }
  0x3d   : > { %1248 = vmatpush3.bf16.xpose.msra.mxu0 %v387_v41 }
  0x3e   : > { %1262 = vmatprep.subr.msk.bf16.mxu0 %vm370_vm0, %v348_v42 }
  0x45   : > { %1250 = vmatpush3.bf16.xpose.msra.mxu0 %v390_v48  ;;  %v565_v48 = vshrl.u32 %v564_v47, 7 }
  0x46   : > { %1263 = vmatprep.subr.msk.bf16.mxu0 %vm370_vm0, %v349_v49  ;;  %v1601_v49 = vmov 1966171168  }
  0x47   : > { %v624_v50 = vunpack.c.l.s4 %v1601_v49  ;;  %v566_v51 = vsub.s32 0, %v565_v48 }
  0x49   : > { %v625_v53 = vunpack.c.0.s8 %v624_v50 }
  0x4b   : > { %v628_v59 = vsub.s32 %v625_v53, %v565_v48 }
  0x4d   : > { %1252 = vmatpush3.bf16.xpose.msra.mxu0 %v393_v55 }
  0x4e   : > { %1264 = vmatprep.subr.msk.bf16.mxu0 %vm370_vm0, %v350_v56 }
  0x55   : > { %1254 = vmatpush3.bf16.xpose.msra.mxu0 %v396_v60 }
  0x5c   : > { %1256 = vmatmul.mubr.msk.bf16.vlgmr.msra.gmra.mrb[0].mxu0 %vm370_vm0, %v1680_v1 }
  0x8e   : > { %v358_v63 = vpop.permute.xlu0 %357 }
  0x90   : > { %v496_v29 = vpop.permute.xlu1 %495 }
  0x92   : > { %v363_v5 = vpop.permute.xlu0 %362 }
  0x94   : > { %v562_v52 = vpop.permute.xlu1 %561 }
  0x95   : > { %v567_v54 = vrot.slane %v562_v52, %v566_v51 }
 0x12f   : > { %v456_v0 = vpop.f32.mrb[0].mxu0 }
 0x130   : > { %v457_v2 = vadd.f32 %v456_v0, %v358_v63  ;;  %v458_v4 = vpop.f32.mrb[1].mxu0 }
 0x131   : > { %v459_v6 = vadd.f32 %v458_v4, %v358_v63  ;;  %v460_v7 = vpop.f32.mrb[2].mxu0 }
 0x132   : > { %v1199_v8 = vmul.f32 -1.442695, %v457_v2  ;;  %v461_v9 = vadd.f32 %v460_v7, %v363_v5  ;;  %v462_v10 = vpop.f32.mrb[3].mxu0 }
 0x133   : > { %v1200_v11 = vmul.f32 -1.442695, %v459_v6  ;;  %v463_v12 = vadd.f32 %v462_v10, %v363_v5 }
 0x134   : > { %1424 = vpow2.f32 %v1199_v8  ;;  %v1201_v1 = vmul.f32 -1.442695, %v461_v9 }
 0x135   : > { %1426 = vpow2.f32 %v1200_v11  ;;  %v1202_v13 = vmul.f32 -1.442695, %v463_v12 }
 0x136   : > { %1428 = vpow2.f32 %v1201_v1 }
 0x137   : > { %1430 = vpow2.f32 %v1202_v13 }
 0x13e   : > { %v1425_v14 = vpop.eup %1424 }
 0x13f   : > { %v1427_v15 = vpop.eup %1426  ;;  %v477_v16 = vadd.f32 1.0, %v1425_v14 }
 0x140   : > { %v1429_v17 = vpop.eup %1428  ;;  %v478_v18 = vadd.f32 1.0, %v1427_v15 }
 0x141   : > { %v1431_v19 = vpop.eup %1430  ;;  %1432 = vrcp.f32 %v477_v16  ;;  %v479_v20 = vadd.f32 1.0, %v1429_v17 }
 0x142   : > { %1434 = vrcp.f32 %v478_v18  ;;  %v480_v21 = vadd.f32 1.0, %v1431_v19 }
 0x143   : > { %1436 = vrcp.f32 %v479_v20 }
 0x144   : > { %1438 = vrcp.f32 %v480_v21 }
 0x14b   : > { %v1433_v22 = vpop.eup %1432 }
 0x14c   : > { %v1435_v23 = vpop.eup %1434 }
 0x14d   : > { %v1437_v24 = vpop.eup %1436 }
 0x14e   : > { %v1439_v25 = vpop.eup %1438  ;;  %v489_v26 = vpack.c.bf16 %v1437_v24, %v1433_v22 }
 0x14f   : > { %v490_v27 = vpack.c.bf16 %v1439_v25, %v1435_v23 }
 0x151   : > { %502 = vmatprep.subr.bf16.mxu1 %v490_v27 }
 0x152   : > { %503 = vmatpush1.bf16.msra.mxu1 %v489_v26 }
 0x155   : > { %1203 = vmatmul.mubr.msk.bf16.vlgmr.msra.gmra.mrb[0].mxu1 %vm498_vm1, %v491_v28 }
 0x156   : > { %611 = vmatprep.mubr.bf16.mxu1 %v1600_v3 }
 0x228   : > { %v536_v30 = vpop.f32.mrb[0].mxu1 }
 0x229   : > { %v537_v31 = vadd.f32 %v536_v30, %v496_v29  ;;  %v538_v32 = vpop.f32.mrb[1].mxu1 }
 0x22a   : > { %v539_v33 = vadd.f32 %v538_v32, %v496_v29  ;;  %v540_v34 = vpop.f32.mrb[2].mxu1 }
 0x22b   : > { %v1204_v35 = vmul.f32 -1.442695, %v537_v31  ;;  %v541_v36 = vpop.f32.mrb[3].mxu1 }
 0x22c   : > { %v1205_v37 = vmul.f32 -1.442695, %v539_v33 }
 0x22d   : > { %1440 = vpow2.f32 %v1204_v35 }
 0x22e   : > { %1442 = vpow2.f32 %v1205_v37 }
 0x237   : > { %v1441_v38 = vpop.eup %1440 }
 0x238   : > { %v1443_v39 = vpop.eup %1442  ;;  %v549_v40 = vadd.f32 1.0, %v1441_v38 }
 0x239   : > { %v550_v41 = vadd.f32 1.0, %v1443_v39 }
 0x23a   : > { %1444 = vrcp.f32 %v549_v40 }
 0x23b   : > { %1446 = vrcp.f32 %v550_v41 }
 0x244   : > { %v1445_v42 = vpop.eup %1444 }
 0x245   : > { %v1447_v3 = vpop.eup %1446  ;;  %v555_v43 = vpack.c.bf16 %v1445_v42, %v1445_v42 }
 0x246   : > { %v556_v44 = vpack.c.bf16 %v1447_v3, %v1447_v3 }
 0x247   : > { %v574_v45 = vsel %vm572_vm2, %v555_v43, 0 }
 0x248   : > { %1206 = vmatprep.subr.msk.bf16.mxu1 %vm572_vm2, %v556_v44 }
 0x249   : > { %580 = vmatpush1.bf16.msra.mxu1 %v574_v45 }
 0x24c   : > { %1207 = vmatmul.mubr.msk.bf16.vlgmr.msra.gmra.mrb[4].mxu1 %vm568_vm3, %v557_v46 }
 0x31f   : > { %v613_v55 = vpop.f32.mrb[4].mxu1 }
 0x320   : > { %v614_v56 = vadd.f32 %v613_v55, %v567_v54  ;;  %v615_v57 = vpop.f32.mrb[5].mxu1 }
 0x321   : > { %v616_v58 = vadd.f32 %v615_v57, %v567_v54  ;;  %v617_v60 = vpop.f32.mrb[6].mxu1 }
 0x322   : > { %v618_v61 = vpop.f32.mrb[7].mxu1 }
 0x323   : > { %v622_v62 = vcombine.low %v614_v56, %v616_v58  ;;  %649 = sbr.rel (!%p1672_p4) target bundleno = 975 (0x3cf), region = 52 }
 0x325   : > { %v629_v63 = vrot.slane %v622_v62, %v628_v59 }
 0x327   : > { %v636_v0 = vrot.slane %v629_v63, %v628_v59 }
 0x329   : > { %642 = vst.msk [vmem:[%s1759_s12] sm:$0x3] %vm640_vm4, %v636_v0 }
 0x32a   : > { %s2209_s26 = smov (!%p652_p8, %s651_s26), 2 }
 0x32b   : > { %s1210_s17 = sshll.u32 %s2209_s26, 4 }
 0x32c   : > { %p1212_p9 = scmp.eq.s32.totalorder %s1210_s17, 0 }
 0x32d   : > { %p660_p10 = scmp.lt.u32.totalorder (!%p1212_p9), %s2209_s26, 8 }
 0x32e   : > { %659 = sbr.rel (%p1212_p9) target bundleno = 975 (0x3cf), region = 56 }
 0x335   : > { %663 = sbr.rel (%p660_p10) target bundleno = 966 (0x3c6), region = 60  ;;  %s1775_s10 = sand.u32 (!%p660_p10), 7, %s2209_s26  }
 0x336   : > { %p679_p11 = scmp.eq.s32.totalorder (!%p660_p10), %s1775_s10, 0  ;;  %p1213_p12 = scmp.ne.s32.totalorder (!%p660_p10), %s1775_s10, 0 }
 0x33c   : > { %682 = sbr.rel (%p1213_p12) target bundleno = 895 (0x37f), region = 75  ;;  %s683_s6 = sshrl.u32 (!%p1213_p12), %s2209_s26, 3 }
 0x33d   : > { %s1782_s18 = sshrl.u32 (!%p1213_p12), %s683_s6, 6 }
 0x33e   : > { %p1214_p13 = scmp.le.s32.totalorder (!%p1213_p12), %s1782_s18, 0 }
 0x343   : > { %1118 = sbr.rel (%p1214_p13) target bundleno = 875 (0x36b), region = 156  ;;  %s2193_s19 = smov (!%p1214_p13), %s1768_s16 }
 0x344   : > { %s2194_s20 = smov (!%p1214_p13), %s1759_s12  ;;  %s1791_s21 = smov (!%p1214_p13), 0  }
 0x345   : > { %s1793_s22 = smov (!%p1214_p13), 0  }
 0x34a LB: >> { %v696_v2 = vld [vmem:[%s1542_s20] sm:$0xff]  ;;  %v698_v4 = vld [vmem:[%s1542_s20 + $0x8] sm:$0xff]  ;;  %v700_v5 = vld [vmem:[%s1542_s20 + $0x10] sm:$0xff]  ;;  %s824_s23 = sadd.s32 1, %s1546_s21  ;;  %s690_s22 = sadd.s32 1, %s1550_s22   ;;  %s1550_s22 = sphi %s1793_s22, %s690_s22   ;;  %s1546_s21 = sphi %s1791_s21, %s2197_s21   ;;  %s1542_s20 = sphi %s2194_s20, %s2196_s20   ;;  %s1538_s19 = sphi %s2193_s19, %s2195_s19  }
 0x34b   : >> { %697 = vst [vmem:[%s1538_s19] sm:$0xff] %v696_v2  ;;  %699 = vst [vmem:[%s1538_s19 + $0x8] sm:$0xff] %v698_v4  ;;  %v702_v6 = vld [vmem:[%s1542_s20 + $0x18] sm:$0xff]  ;;  %v704_v7 = vld [vmem:[%s1542_s20 + $0x20] sm:$0xff]  ;;  %p825_p0 = scmp.ge.s32.totalorder %s824_s23, %s1782_s18  ;;  %p689_p1 = scmp.ge.s32.totalorder %s690_s22, %s1782_s18 }
 0x34c   : >> { %701 = vst [vmem:[%s1538_s19 + $0x10] sm:$0xff] %v700_v5  ;;  %v706_v8 = vld [vmem:[%s1542_s20 + $0x28] sm:$0xff]  ;;  %703 = vst [vmem:[%s1538_s19 + $0x18] sm:$0xff] %v702_v6  ;;  %v708_v9 = vld [vmem:[%s1542_s20 + $0x30] sm:$0xff] }
 0x34d   : >> { %705 = vst [vmem:[%s1538_s19 + $0x20] sm:$0xff] %v704_v7  ;;  %707 = vst [vmem:[%s1538_s19 + $0x28] sm:$0xff] %v706_v8  ;;  %v710_v10 = vld [vmem:[%s1542_s20 + $0x38] sm:$0xff]  ;;  %v712_v11 = vld [vmem:[%s1542_s20 + $0x40] sm:$0xff]  ;;  %s2211_s23 = smov (%p825_p0, %s824_s23), 0 }
 0x34e   : >> { %709 = vst [vmem:[%s1538_s19 + $0x30] sm:$0xff] %v708_v9  ;;  %711 = vst [vmem:[%s1538_s19 + $0x38] sm:$0xff] %v710_v10  ;;  %v714_v12 = vld [vmem:[%s1542_s20 + $0x48] sm:$0xff]  ;;  %v716_v1 = vld [vmem:[%s1542_s20 + $0x50] sm:$0xff]  ;;  %s1215_s24 = sshll.u32 %s2211_s23, 9  ;;  %s2197_s21 = smov %s2211_s23 }
 0x34f   : >> { %713 = vst [vmem:[%s1538_s19 + $0x40] sm:$0xff] %v712_v11  ;;  %v718_v13 = vld [vmem:[%s1542_s20 + $0x58] sm:$0xff]  ;;  %715 = vst [vmem:[%s1538_s19 + $0x48] sm:$0xff] %v714_v12  ;;  %v720_v14 = vld [vmem:[%s1542_s20 + $0x60] sm:$0xff]  ;;  %s1849_s25 = scalar_lea.vmem %s1759_s12, %s1215_s24 [#allocation3]   ;;  %s1852_s28 = scalar_lea.vmem %s1768_s16, %s1215_s24  }
 0x350   : >> { %717 = vst [vmem:[%s1538_s19 + $0x50] sm:$0xff] %v716_v1  ;;  %719 = vst [vmem:[%s1538_s19 + $0x58] sm:$0xff] %v718_v13  ;;  %v722_v15 = vld [vmem:[%s1542_s20 + $0x68] sm:$0xff]  ;;  %v724_v16 = vld [vmem:[%s1542_s20 + $0x70] sm:$0xff] }
 0x351   : >> { %721 = vst [vmem:[%s1538_s19 + $0x60] sm:$0xff] %v720_v14  ;;  %723 = vst [vmem:[%s1538_s19 + $0x68] sm:$0xff] %v722_v15  ;;  %v726_v17 = vld [vmem:[%s1542_s20 + $0x78] sm:$0xff]  ;;  %v728_v18 = vld [vmem:[%s1542_s20 + $0x80] sm:$0xff] }
 0x352   : >> { %725 = vst [vmem:[%s1538_s19 + $0x70] sm:$0xff] %v724_v16  ;;  %v730_v19 = vld [vmem:[%s1542_s20 + $0x88] sm:$0xff]  ;;  %727 = vst [vmem:[%s1538_s19 + $0x78] sm:$0xff] %v726_v17  ;;  %v732_v20 = vld [vmem:[%s1542_s20 + $0x90] sm:$0xff] }
 0x353   : >> { %729 = vst [vmem:[%s1538_s19 + $0x80] sm:$0xff] %v728_v18  ;;  %731 = vst [vmem:[%s1538_s19 + $0x88] sm:$0xff] %v730_v19  ;;  %v734_v21 = vld [vmem:[%s1542_s20 + $0x98] sm:$0xff]  ;;  %v736_v22 = vld [vmem:[%s1542_s20 + $0xa0] sm:$0xff] }
 0x354   : >> { %733 = vst [vmem:[%s1538_s19 + $0x90] sm:$0xff] %v732_v20  ;;  %735 = vst [vmem:[%s1538_s19 + $0x98] sm:$0xff] %v734_v21  ;;  %v738_v23 = vld [vmem:[%s1542_s20 + $0xa8] sm:$0xff]  ;;  %v740_v24 = vld [vmem:[%s1542_s20 + $0xb0] sm:$0xff] }
 0x355   : >> { %737 = vst [vmem:[%s1538_s19 + $0xa0] sm:$0xff] %v736_v22  ;;  %v742_v25 = vld [vmem:[%s1542_s20 + $0xb8] sm:$0xff]  ;;  %739 = vst [vmem:[%s1538_s19 + $0xa8] sm:$0xff] %v738_v23  ;;  %v744_v26 = vld [vmem:[%s1542_s20 + $0xc0] sm:$0xff] }
 0x356   : >> { %741 = vst [vmem:[%s1538_s19 + $0xb0] sm:$0xff] %v740_v24  ;;  %743 = vst [vmem:[%s1538_s19 + $0xb8] sm:$0xff] %v742_v25  ;;  %v746_v27 = vld [vmem:[%s1542_s20 + $0xc8] sm:$0xff]  ;;  %v748_v28 = vld [vmem:[%s1542_s20 + $0xd0] sm:$0xff] }
 0x357   : >> { %745 = vst [vmem:[%s1538_s19 + $0xc0] sm:$0xff] %v744_v26  ;;  %747 = vst [vmem:[%s1538_s19 + $0xc8] sm:$0xff] %v746_v27  ;;  %v750_v29 = vld [vmem:[%s1542_s20 + $0xd8] sm:$0xff]  ;;  %v752_v30 = vld [vmem:[%s1542_s20 + $0xe0] sm:$0xff] }
 0x358   : >> { %749 = vst [vmem:[%s1538_s19 + $0xd0] sm:$0xff] %v748_v28  ;;  %v754_v31 = vld [vmem:[%s1542_s20 + $0xe8] sm:$0xff]  ;;  %751 = vst [vmem:[%s1538_s19 + $0xd8] sm:$0xff] %v750_v29  ;;  %v756_v32 = vld [vmem:[%s1542_s20 + $0xf0] sm:$0xff] }
 0x359   : >> { %753 = vst [vmem:[%s1538_s19 + $0xe0] sm:$0xff] %v752_v30  ;;  %755 = vst [vmem:[%s1538_s19 + $0xe8] sm:$0xff] %v754_v31  ;;  %v758_v33 = vld [vmem:[%s1542_s20 + $0xf8] sm:$0xff]  ;;  %v760_v34 = vld [vmem:[%s1542_s20 + $0x100] sm:$0xff] }
 0x35a   : >> { %757 = vst [vmem:[%s1538_s19 + $0xf0] sm:$0xff] %v756_v32  ;;  %759 = vst [vmem:[%s1538_s19 + $0xf8] sm:$0xff] %v758_v33  ;;  %v762_v35 = vld [vmem:[%s1542_s20 + $0x108] sm:$0xff]  ;;  %v764_v36 = vld [vmem:[%s1542_s20 + $0x110] sm:$0xff] }
 0x35b   : >> { %761 = vst [vmem:[%s1538_s19 + $0x100] sm:$0xff] %v760_v34  ;;  %v766_v37 = vld [vmem:[%s1542_s20 + $0x118] sm:$0xff]  ;;  %763 = vst [vmem:[%s1538_s19 + $0x108] sm:$0xff] %v762_v35  ;;  %v768_v38 = vld [vmem:[%s1542_s20 + $0x120] sm:$0xff] }
 0x35c   : >> { %765 = vst [vmem:[%s1538_s19 + $0x110] sm:$0xff] %v764_v36  ;;  %767 = vst [vmem:[%s1538_s19 + $0x118] sm:$0xff] %v766_v37  ;;  %v770_v39 = vld [vmem:[%s1542_s20 + $0x128] sm:$0xff]  ;;  %v772_v40 = vld [vmem:[%s1542_s20 + $0x130] sm:$0xff] }
 0x35d   : >> { %769 = vst [vmem:[%s1538_s19 + $0x120] sm:$0xff] %v768_v38  ;;  %771 = vst [vmem:[%s1538_s19 + $0x128] sm:$0xff] %v770_v39  ;;  %v774_v41 = vld [vmem:[%s1542_s20 + $0x138] sm:$0xff]  ;;  %v776_v42 = vld [vmem:[%s1542_s20 + $0x140] sm:$0xff] }
 0x35e   : >> { %773 = vst [vmem:[%s1538_s19 + $0x130] sm:$0xff] %v772_v40  ;;  %v778_v3 = vld [vmem:[%s1542_s20 + $0x148] sm:$0xff]  ;;  %775 = vst [vmem:[%s1538_s19 + $0x138] sm:$0xff] %v774_v41  ;;  %v780_v43 = vld [vmem:[%s1542_s20 + $0x150] sm:$0xff] }
 0x35f   : >> { %777 = vst [vmem:[%s1538_s19 + $0x140] sm:$0xff] %v776_v42  ;;  %779 = vst [vmem:[%s1538_s19 + $0x148] sm:$0xff] %v778_v3  ;;  %v782_v44 = vld [vmem:[%s1542_s20 + $0x158] sm:$0xff]  ;;  %v784_v45 = vld [vmem:[%s1542_s20 + $0x160] sm:$0xff] }
 0x360   : >> { %781 = vst [vmem:[%s1538_s19 + $0x150] sm:$0xff] %v780_v43  ;;  %783 = vst [vmem:[%s1538_s19 + $0x158] sm:$0xff] %v782_v44  ;;  %v786_v46 = vld [vmem:[%s1542_s20 + $0x168] sm:$0xff]  ;;  %v788_v47 = vld [vmem:[%s1542_s20 + $0x170] sm:$0xff] }
 0x361   : >> { %785 = vst [vmem:[%s1538_s19 + $0x160] sm:$0xff] %v784_v45  ;;  %v790_v48 = vld [vmem:[%s1542_s20 + $0x178] sm:$0xff]  ;;  %787 = vst [vmem:[%s1538_s19 + $0x168] sm:$0xff] %v786_v46  ;;  %v792_v49 = vld [vmem:[%s1542_s20 + $0x180] sm:$0xff] }
 0x362   : >> { %789 = vst [vmem:[%s1538_s19 + $0x170] sm:$0xff] %v788_v47  ;;  %791 = vst [vmem:[%s1538_s19 + $0x178] sm:$0xff] %v790_v48  ;;  %v794_v50 = vld [vmem:[%s1542_s20 + $0x188] sm:$0xff]  ;;  %v796_v51 = vld [vmem:[%s1542_s20 + $0x190] sm:$0xff] }
 0x363   : >> { %793 = vst [vmem:[%s1538_s19 + $0x180] sm:$0xff] %v792_v49  ;;  %795 = vst [vmem:[%s1538_s19 + $0x188] sm:$0xff] %v794_v50  ;;  %v798_v52 = vld [vmem:[%s1542_s20 + $0x198] sm:$0xff]  ;;  %v800_v53 = vld [vmem:[%s1542_s20 + $0x1a0] sm:$0xff] }
 0x364   : >> { %797 = vst [vmem:[%s1538_s19 + $0x190] sm:$0xff] %v796_v51  ;;  %v802_v54 = vld [vmem:[%s1542_s20 + $0x1a8] sm:$0xff]  ;;  %799 = vst [vmem:[%s1538_s19 + $0x198] sm:$0xff] %v798_v52  ;;  %v804_v55 = vld [vmem:[%s1542_s20 + $0x1b0] sm:$0xff]  ;;  %692 = sbr.rel (!%p689_p1) target bundleno = 842 (0x34a), region = 162 }
 0x365   : >> { %801 = vst [vmem:[%s1538_s19 + $0x1a0] sm:$0xff] %v800_v53  ;;  %803 = vst [vmem:[%s1538_s19 + $0x1a8] sm:$0xff] %v802_v54  ;;  %v806_v56 = vld [vmem:[%s1542_s20 + $0x1b8] sm:$0xff]  ;;  %v808_v57 = vld [vmem:[%s1542_s20 + $0x1c0] sm:$0xff] }
 0x366   : >> { %805 = vst [vmem:[%s1538_s19 + $0x1b0] sm:$0xff] %v804_v55  ;;  %807 = vst [vmem:[%s1538_s19 + $0x1b8] sm:$0xff] %v806_v56  ;;  %v810_v58 = vld [vmem:[%s1542_s20 + $0x1c8] sm:$0xff]  ;;  %v812_v59 = vld [vmem:[%s1542_s20 + $0x1d0] sm:$0xff] }
 0x367   : >> { %809 = vst [vmem:[%s1538_s19 + $0x1c0] sm:$0xff] %v808_v57  ;;  %v814_v60 = vld [vmem:[%s1542_s20 + $0x1d8] sm:$0xff]  ;;  %811 = vst [vmem:[%s1538_s19 + $0x1c8] sm:$0xff] %v810_v58  ;;  %v816_v61 = vld [vmem:[%s1542_s20 + $0x1e0] sm:$0xff] }
 0x368   : >> { %813 = vst [vmem:[%s1538_s19 + $0x1d0] sm:$0xff] %v812_v59  ;;  %815 = vst [vmem:[%s1538_s19 + $0x1d8] sm:$0xff] %v814_v60  ;;  %v818_v62 = vld [vmem:[%s1542_s20 + $0x1e8] sm:$0xff]  ;;  %v820_v63 = vld [vmem:[%s1542_s20 + $0x1f0] sm:$0xff] }
 0x369   : >> { %817 = vst [vmem:[%s1538_s19 + $0x1e0] sm:$0xff] %v816_v61  ;;  %819 = vst [vmem:[%s1538_s19 + $0x1e8] sm:$0xff] %v818_v62  ;;  %v822_v0 = vld [vmem:[%s1542_s20 + $0x1f8] sm:$0xff]  ;;  %s2196_s20 = smov %s1849_s25 }
 0x36a   : >> { %821 = vst [vmem:[%s1538_s19 + $0x1f0] sm:$0xff] %v820_v63  ;;  %823 = vst [vmem:[%s1538_s19 + $0x1f8] sm:$0xff] %v822_v0  ;;  %s2195_s19 = smov %s1852_s28 }
 0x36b PF: > { %s1958_s30 = sand.u32 63, %s683_s6   ;;  %s1235_s8 = sshll.u32 %s1782_s18, 13 }
 0x36c   : > { %s835_s11 = sshra.s32 %s1235_s8, 4  ;;  %p1220_p2 = scmp.le.s32.totalorder %s1958_s30, 0 }
 0x36d   : > { %s836_s13 = scalar_lea.vmem %s1759_s12, %s835_s11 [#allocation3]   ;;  %s839_s14 = scalar_lea.vmem %s1768_s16, %s835_s11  }
 0x36e   : > { %1132 = sbr.rel (%p1220_p2) target bundleno = 895 (0x37f), region = 167  ;;  %s1552_s15 = smov (!%p1220_p2), %s839_s14  }
 0x36f   : > { %s1556_s17 = smov (!%p1220_p2), %s836_s13   ;;  %s1560_s23 = smov (!%p1220_p2), 0  }
 0x370   : > { %s1564_s22 = smov (!%p1220_p2), 0  }
 0x375 LB: >> { %v851_v2 = vld [vmem:[%s1558_s17] sm:$0xff]  ;;  %s853_s6 = sadd.s32 1, %s1562_s23  ;;  %s845_s22 = sadd.s32 1, %s1566_s22   ;;  %s1566_s22 = sphi %s1564_s22, %s845_s22   ;;  %s1562_s23 = sphi %s1560_s23, %s1561_s23   ;;  %s1558_s17 = sphi %s1556_s17, %s858_s17   ;;  %s1554_s15 = sphi %s1552_s15, %s859_s15  }
 0x376   : >> { %852 = vst [vmem:[%s1554_s15] sm:$0xff] %v851_v2  ;;  %p854_p3 = scmp.ge.s32.totalorder %s853_s6, %s1958_s30  ;;  %p844_p4 = scmp.ge.s32.totalorder %s845_s22, %s1958_s30 }
 0x378   : >> { %s2213_s6 = smov (%p854_p3, %s853_s6), 0  ;;  %847 = sbr.rel (!%p844_p4) target bundleno = 885 (0x375), region = 173 }
 0x379   : >> { %s1221_s18 = sshll.u32 %s2213_s6, 3  ;;  %s1561_s23 = smov %s2213_s6  }
 0x37a   : >> { %s858_s17 = scalar_lea.vmem %s836_s13, %s1221_s18 [#allocation3]   ;;  %s859_s15 = scalar_lea.vmem %s839_s14, %s1221_s18  }
 0x37f PF: > { %862 = sbr.rel (%p679_p11) target bundleno = 966 (0x3c6), region = 93  ;;  %s1970_s19 = ssub.s32 (!%p679_p11), %s2209_s26, %s1775_s10 }
 0x380   : > { %s868_s20 = sshrl.u32 (!%p679_p11), %s2209_s26, 3  ;;  %s865_s21 = scalar_lea.vmem (!%p679_p11), %s1759_s12, %s1970_s19 [#allocation3] }
 0x381   : > { %s867_s24 = scalar_lea.vmem (!%p679_p11), %s1768_s16, %s1970_s19  ;;  %s1979_s25 = sshrl.u32 (!%p679_p11), %s868_s20, 6 }
 0x382   : > { %p1223_p5 = scmp.le.s32.totalorder (!%p679_p11), %s1979_s25, 0 }
 0x386   : > { %1146 = sbr.rel (%p1223_p5) target bundleno = 942 (0x3ae), region = 178  ;;  %s2198_s28 = smov (!%p1223_p5), %s1768_s16 }
 0x387   : > { %s2199_s30 = smov (!%p1223_p5), %s1759_s12  ;;  %s1988_s8 = smov (!%p1223_p5), 0  }
 0x388   : > { %s1990_s11 = smov (!%p1223_p5), 0  }
 0x38d LB: >> { %v881_v4 = vld [vmem:[%s1574_s30] sm:$0xff]  ;;  %v883_v5 = vld [vmem:[%s1574_s30 + $0x8] sm:$0xff]  ;;  %v885_v6 = vld [vmem:[%s1574_s30 + $0x10] sm:$0xff]  ;;  %s1009_s13 = sadd.s32 1, %s1578_s8  ;;  %s875_s11 = sadd.s32 1, %s1582_s11   ;;  %s1582_s11 = sphi %s1990_s11, %s875_s11   ;;  %s1578_s8 = sphi %s1988_s8, %s2202_s8   ;;  %s1574_s30 = sphi %s2199_s30, %s2201_s30   ;;  %s1570_s28 = sphi %s2198_s28, %s2200_s28  }
 0x38e   : >> { %882 = vst [vmem:[%s1570_s28] sm:$0xff] %v881_v4  ;;  %884 = vst [vmem:[%s1570_s28 + $0x8] sm:$0xff] %v883_v5  ;;  %v887_v7 = vld [vmem:[%s1574_s30 + $0x18] sm:$0xff]  ;;  %v889_v8 = vld [vmem:[%s1574_s30 + $0x20] sm:$0xff]  ;;  %p1010_p6 = scmp.ge.s32.totalorder %s1009_s13, %s1979_s25  ;;  %p874_p7 = scmp.ge.s32.totalorder %s875_s11, %s1979_s25 }
 0x38f   : >> { %886 = vst [vmem:[%s1570_s28 + $0x10] sm:$0xff] %v885_v6  ;;  %v891_v9 = vld [vmem:[%s1574_s30 + $0x28] sm:$0xff]  ;;  %888 = vst [vmem:[%s1570_s28 + $0x18] sm:$0xff] %v887_v7  ;;  %v893_v10 = vld [vmem:[%s1574_s30 + $0x30] sm:$0xff] }
 0x390   : >> { %890 = vst [vmem:[%s1570_s28 + $0x20] sm:$0xff] %v889_v8  ;;  %892 = vst [vmem:[%s1570_s28 + $0x28] sm:$0xff] %v891_v9  ;;  %v895_v11 = vld [vmem:[%s1574_s30 + $0x38] sm:$0xff]  ;;  %v897_v12 = vld [vmem:[%s1574_s30 + $0x40] sm:$0xff]  ;;  %s2215_s13 = smov (%p1010_p6, %s1009_s13), 0 }
 0x391   : >> { %894 = vst [vmem:[%s1570_s28 + $0x30] sm:$0xff] %v893_v10  ;;  %896 = vst [vmem:[%s1570_s28 + $0x38] sm:$0xff] %v895_v11  ;;  %v899_v1 = vld [vmem:[%s1574_s30 + $0x48] sm:$0xff]  ;;  %v901_v13 = vld [vmem:[%s1574_s30 + $0x50] sm:$0xff]  ;;  %s1224_s14 = sshll.u32 %s2215_s13, 9  ;;  %s2202_s8 = smov %s2215_s13 }
 0x392   : >> { %898 = vst [vmem:[%s1570_s28 + $0x40] sm:$0xff] %v897_v12  ;;  %v903_v14 = vld [vmem:[%s1574_s30 + $0x58] sm:$0xff]  ;;  %900 = vst [vmem:[%s1570_s28 + $0x48] sm:$0xff] %v899_v1  ;;  %v905_v15 = vld [vmem:[%s1574_s30 + $0x60] sm:$0xff]  ;;  %s2046_s15 = scalar_lea.vmem %s1759_s12, %s1224_s14 [#allocation3]   ;;  %s2049_s17 = scalar_lea.vmem %s1768_s16, %s1224_s14  }
 0x393   : >> { %902 = vst [vmem:[%s1570_s28 + $0x50] sm:$0xff] %v901_v13  ;;  %904 = vst [vmem:[%s1570_s28 + $0x58] sm:$0xff] %v903_v14  ;;  %v907_v16 = vld [vmem:[%s1574_s30 + $0x68] sm:$0xff]  ;;  %v909_v17 = vld [vmem:[%s1574_s30 + $0x70] sm:$0xff] }
 0x394   : >> { %906 = vst [vmem:[%s1570_s28 + $0x60] sm:$0xff] %v905_v15  ;;  %908 = vst [vmem:[%s1570_s28 + $0x68] sm:$0xff] %v907_v16  ;;  %v911_v18 = vld [vmem:[%s1574_s30 + $0x78] sm:$0xff]  ;;  %v913_v19 = vld [vmem:[%s1574_s30 + $0x80] sm:$0xff] }
 0x395   : >> { %910 = vst [vmem:[%s1570_s28 + $0x70] sm:$0xff] %v909_v17  ;;  %v915_v20 = vld [vmem:[%s1574_s30 + $0x88] sm:$0xff]  ;;  %912 = vst [vmem:[%s1570_s28 + $0x78] sm:$0xff] %v911_v18  ;;  %v917_v21 = vld [vmem:[%s1574_s30 + $0x90] sm:$0xff] }
 0x396   : >> { %914 = vst [vmem:[%s1570_s28 + $0x80] sm:$0xff] %v913_v19  ;;  %916 = vst [vmem:[%s1570_s28 + $0x88] sm:$0xff] %v915_v20  ;;  %v919_v22 = vld [vmem:[%s1574_s30 + $0x98] sm:$0xff]  ;;  %v921_v23 = vld [vmem:[%s1574_s30 + $0xa0] sm:$0xff] }
 0x397   : >> { %918 = vst [vmem:[%s1570_s28 + $0x90] sm:$0xff] %v917_v21  ;;  %920 = vst [vmem:[%s1570_s28 + $0x98] sm:$0xff] %v919_v22  ;;  %v923_v24 = vld [vmem:[%s1574_s30 + $0xa8] sm:$0xff]  ;;  %v925_v25 = vld [vmem:[%s1574_s30 + $0xb0] sm:$0xff] }
 0x398   : >> { %922 = vst [vmem:[%s1570_s28 + $0xa0] sm:$0xff] %v921_v23  ;;  %v927_v26 = vld [vmem:[%s1574_s30 + $0xb8] sm:$0xff]  ;;  %924 = vst [vmem:[%s1570_s28 + $0xa8] sm:$0xff] %v923_v24  ;;  %v929_v27 = vld [vmem:[%s1574_s30 + $0xc0] sm:$0xff] }
 0x399   : >> { %926 = vst [vmem:[%s1570_s28 + $0xb0] sm:$0xff] %v925_v25  ;;  %928 = vst [vmem:[%s1570_s28 + $0xb8] sm:$0xff] %v927_v26  ;;  %v931_v28 = vld [vmem:[%s1574_s30 + $0xc8] sm:$0xff]  ;;  %v933_v29 = vld [vmem:[%s1574_s30 + $0xd0] sm:$0xff] }
 0x39a   : >> { %930 = vst [vmem:[%s1570_s28 + $0xc0] sm:$0xff] %v929_v27  ;;  %932 = vst [vmem:[%s1570_s28 + $0xc8] sm:$0xff] %v931_v28  ;;  %v935_v30 = vld [vmem:[%s1574_s30 + $0xd8] sm:$0xff]  ;;  %v937_v31 = vld [vmem:[%s1574_s30 + $0xe0] sm:$0xff] }
 0x39b   : >> { %934 = vst [vmem:[%s1570_s28 + $0xd0] sm:$0xff] %v933_v29  ;;  %v939_v32 = vld [vmem:[%s1574_s30 + $0xe8] sm:$0xff]  ;;  %936 = vst [vmem:[%s1570_s28 + $0xd8] sm:$0xff] %v935_v30  ;;  %v941_v33 = vld [vmem:[%s1574_s30 + $0xf0] sm:$0xff] }
 0x39c   : >> { %938 = vst [vmem:[%s1570_s28 + $0xe0] sm:$0xff] %v937_v31  ;;  %940 = vst [vmem:[%s1570_s28 + $0xe8] sm:$0xff] %v939_v32  ;;  %v943_v34 = vld [vmem:[%s1574_s30 + $0xf8] sm:$0xff]  ;;  %v945_v35 = vld [vmem:[%s1574_s30 + $0x100] sm:$0xff] }
 0x39d   : >> { %942 = vst [vmem:[%s1570_s28 + $0xf0] sm:$0xff] %v941_v33  ;;  %944 = vst [vmem:[%s1570_s28 + $0xf8] sm:$0xff] %v943_v34  ;;  %v947_v36 = vld [vmem:[%s1574_s30 + $0x108] sm:$0xff]  ;;  %v949_v37 = vld [vmem:[%s1574_s30 + $0x110] sm:$0xff] }
 0x39e   : >> { %946 = vst [vmem:[%s1570_s28 + $0x100] sm:$0xff] %v945_v35  ;;  %v951_v38 = vld [vmem:[%s1574_s30 + $0x118] sm:$0xff]  ;;  %948 = vst [vmem:[%s1570_s28 + $0x108] sm:$0xff] %v947_v36  ;;  %v953_v39 = vld [vmem:[%s1574_s30 + $0x120] sm:$0xff] }
 0x39f   : >> { %950 = vst [vmem:[%s1570_s28 + $0x110] sm:$0xff] %v949_v37  ;;  %952 = vst [vmem:[%s1570_s28 + $0x118] sm:$0xff] %v951_v38  ;;  %v955_v40 = vld [vmem:[%s1574_s30 + $0x128] sm:$0xff]  ;;  %v957_v41 = vld [vmem:[%s1574_s30 + $0x130] sm:$0xff] }
 0x3a0   : >> { %954 = vst [vmem:[%s1570_s28 + $0x120] sm:$0xff] %v953_v39  ;;  %956 = vst [vmem:[%s1570_s28 + $0x128] sm:$0xff] %v955_v40  ;;  %v959_v42 = vld [vmem:[%s1574_s30 + $0x138] sm:$0xff]  ;;  %v961_v3 = vld [vmem:[%s1574_s30 + $0x140] sm:$0xff] }
 0x3a1   : >> { %958 = vst [vmem:[%s1570_s28 + $0x130] sm:$0xff] %v957_v41  ;;  %v963_v43 = vld [vmem:[%s1574_s30 + $0x148] sm:$0xff]  ;;  %960 = vst [vmem:[%s1570_s28 + $0x138] sm:$0xff] %v959_v42  ;;  %v965_v44 = vld [vmem:[%s1574_s30 + $0x150] sm:$0xff] }
 0x3a2   : >> { %962 = vst [vmem:[%s1570_s28 + $0x140] sm:$0xff] %v961_v3  ;;  %964 = vst [vmem:[%s1570_s28 + $0x148] sm:$0xff] %v963_v43  ;;  %v967_v45 = vld [vmem:[%s1574_s30 + $0x158] sm:$0xff]  ;;  %v969_v46 = vld [vmem:[%s1574_s30 + $0x160] sm:$0xff] }
 0x3a3   : >> { %966 = vst [vmem:[%s1570_s28 + $0x150] sm:$0xff] %v965_v44  ;;  %968 = vst [vmem:[%s1570_s28 + $0x158] sm:$0xff] %v967_v45  ;;  %v971_v47 = vld [vmem:[%s1574_s30 + $0x168] sm:$0xff]  ;;  %v973_v48 = vld [vmem:[%s1574_s30 + $0x170] sm:$0xff] }
 0x3a4   : >> { %970 = vst [vmem:[%s1570_s28 + $0x160] sm:$0xff] %v969_v46  ;;  %v975_v49 = vld [vmem:[%s1574_s30 + $0x178] sm:$0xff]  ;;  %972 = vst [vmem:[%s1570_s28 + $0x168] sm:$0xff] %v971_v47  ;;  %v977_v50 = vld [vmem:[%s1574_s30 + $0x180] sm:$0xff] }
 0x3a5   : >> { %974 = vst [vmem:[%s1570_s28 + $0x170] sm:$0xff] %v973_v48  ;;  %976 = vst [vmem:[%s1570_s28 + $0x178] sm:$0xff] %v975_v49  ;;  %v979_v51 = vld [vmem:[%s1574_s30 + $0x188] sm:$0xff]  ;;  %v981_v52 = vld [vmem:[%s1574_s30 + $0x190] sm:$0xff] }
 0x3a6   : >> { %978 = vst [vmem:[%s1570_s28 + $0x180] sm:$0xff] %v977_v50  ;;  %980 = vst [vmem:[%s1570_s28 + $0x188] sm:$0xff] %v979_v51  ;;  %v983_v53 = vld [vmem:[%s1574_s30 + $0x198] sm:$0xff]  ;;  %v985_v54 = vld [vmem:[%s1574_s30 + $0x1a0] sm:$0xff] }
 0x3a7   : >> { %982 = vst [vmem:[%s1570_s28 + $0x190] sm:$0xff] %v981_v52  ;;  %v987_v55 = vld [vmem:[%s1574_s30 + $0x1a8] sm:$0xff]  ;;  %984 = vst [vmem:[%s1570_s28 + $0x198] sm:$0xff] %v983_v53  ;;  %v989_v56 = vld [vmem:[%s1574_s30 + $0x1b0] sm:$0xff]  ;;  %877 = sbr.rel (!%p874_p7) target bundleno = 909 (0x38d), region = 184 }
 0x3a8   : >> { %986 = vst [vmem:[%s1570_s28 + $0x1a0] sm:$0xff] %v985_v54  ;;  %988 = vst [vmem:[%s1570_s28 + $0x1a8] sm:$0xff] %v987_v55  ;;  %v991_v57 = vld [vmem:[%s1574_s30 + $0x1b8] sm:$0xff]  ;;  %v993_v58 = vld [vmem:[%s1574_s30 + $0x1c0] sm:$0xff] }
 0x3a9   : >> { %990 = vst [vmem:[%s1570_s28 + $0x1b0] sm:$0xff] %v989_v56  ;;  %992 = vst [vmem:[%s1570_s28 + $0x1b8] sm:$0xff] %v991_v57  ;;  %v995_v59 = vld [vmem:[%s1574_s30 + $0x1c8] sm:$0xff]  ;;  %v997_v60 = vld [vmem:[%s1574_s30 + $0x1d0] sm:$0xff] }
 0x3aa   : >> { %994 = vst [vmem:[%s1570_s28 + $0x1c0] sm:$0xff] %v993_v58  ;;  %v999_v61 = vld [vmem:[%s1574_s30 + $0x1d8] sm:$0xff]  ;;  %996 = vst [vmem:[%s1570_s28 + $0x1c8] sm:$0xff] %v995_v59  ;;  %v1001_v62 = vld [vmem:[%s1574_s30 + $0x1e0] sm:$0xff] }
 0x3ab   : >> { %998 = vst [vmem:[%s1570_s28 + $0x1d0] sm:$0xff] %v997_v60  ;;  %1000 = vst [vmem:[%s1570_s28 + $0x1d8] sm:$0xff] %v999_v61  ;;  %v1003_v63 = vld [vmem:[%s1574_s30 + $0x1e8] sm:$0xff]  ;;  %v1005_v0 = vld [vmem:[%s1574_s30 + $0x1f0] sm:$0xff] }
 0x3ac   : >> { %1002 = vst [vmem:[%s1570_s28 + $0x1e0] sm:$0xff] %v1001_v62  ;;  %1004 = vst [vmem:[%s1570_s28 + $0x1e8] sm:$0xff] %v1003_v63  ;;  %v1007_v2 = vld [vmem:[%s1574_s30 + $0x1f8] sm:$0xff]  ;;  %s2201_s30 = smov %s2046_s15 }
 0x3ad   : >> { %1006 = vst [vmem:[%s1570_s28 + $0x1f0] sm:$0xff] %v1005_v0  ;;  %1008 = vst [vmem:[%s1570_s28 + $0x1f8] sm:$0xff] %v1007_v2  ;;  %s2200_s28 = smov %s2049_s17 }
 0x3ae PF: > { %s2155_s23 = sand.u32 63, %s868_s20   ;;  %s1237_s22 = sshll.u32 %s1979_s25, 13 }
 0x3af   : > { %s1020_s6 = sshra.s32 %s1237_s22, 4  ;;  %p1229_p8 = scmp.le.s32.totalorder %s2155_s23, 0 }
 0x3b0   : > { %s1021_s18 = scalar_lea.vmem %s1759_s12, %s1020_s6 [#allocation3]   ;;  %s1024_s14 = scalar_lea.vmem %s1768_s16, %s1020_s6  }
 0x3b1   : > { %1160 = sbr.rel (%p1229_p8) target bundleno = 962 (0x3c2), region = 189  ;;  %s1584_s15 = smov (!%p1229_p8), %s1024_s14  }
 0x3b2   : > { %s1588_s13 = smov (!%p1229_p8), %s1021_s18   ;;  %s1592_s17 = smov (!%p1229_p8), 0  }
 0x3b3   : > { %s1596_s11 = smov (!%p1229_p8), 0  }
 0x3b8 LB: >> { %v1036_v4 = vld [vmem:[%s1590_s13] sm:$0xff]  ;;  %s1038_s20 = sadd.s32 1, %s1594_s17  ;;  %s1030_s11 = sadd.s32 1, %s1598_s11   ;;  %s1598_s11 = sphi %s1596_s11, %s1030_s11   ;;  %s1594_s17 = sphi %s1592_s17, %s1593_s17   ;;  %s1590_s13 = sphi %s1588_s13, %s1043_s13   ;;  %s1586_s15 = sphi %s1584_s15, %s1044_s15  }
 0x3b9   : >> { %1037 = vst [vmem:[%s1586_s15] sm:$0xff] %v1036_v4  ;;  %p1039_p9 = scmp.ge.s32.totalorder %s1038_s20, %s2155_s23  ;;  %p1029_p10 = scmp.ge.s32.totalorder %s1030_s11, %s2155_s23 }
 0x3bb   : >> { %s2217_s20 = smov (%p1039_p9, %s1038_s20), 0  ;;  %1032 = sbr.rel (!%p1029_p10) target bundleno = 952 (0x3b8), region = 195 }
 0x3bc   : >> { %s1230_s25 = sshll.u32 %s2217_s20, 3  ;;  %s1593_s17 = smov %s2217_s20  }
 0x3bd   : >> { %s1043_s13 = scalar_lea.vmem %s1021_s18, %s1230_s25 [#allocation3]   ;;  %s1044_s15 = scalar_lea.vmem %s1024_s14, %s1230_s25  }
 0x3c2 PF: > { %s1602_s28 = smov 0  }
 0x3c3   : > { %s1045_s30 = sshllo.u32 %s1602_s28, %s1775_s10 }
 0x3c4   : > { %v1054_v5 = vld [vmem:[%s865_s21] sm:%s1045_s30] }
 0x3c5   : > { %1055 = vst [vmem:[%s867_s24] sm:%s1045_s30] %v1054_v5 }
 0x3c6 PF: > { %p1232_p11 = scmp.ge.u32.totalorder %s2209_s26, 8 }
 0x3c7   : > { %s1603_s8 = smov (!%p1232_p11), 0  }
 0x3c8   : > { %666 = sbr.rel (%p1232_p11) target bundleno = 975 (0x3cf), region = 64  ;;  %s667_s23 = sshllo.u32 (!%p1232_p11), %s1603_s8, %s2209_s26 }
 0x3c9   : > { %v676_v6 = vld [vmem:[%s1759_s12] sm:%s667_s23] (!%p1232_p11) }
 0x3ca   : > { %677 = vst [vmem:[%s1768_s16] sm:%s667_s23] (!%p1232_p11), %v676_v6 }
 0x3cf PF: > { %p16_p12 = scmp.ge.s32.totalorder %s1662_s29, 4   ;;  %s2203_s26 = smov %s1530_s27 }
 0x3d0   : > { %s2204_s27 = smov %s1670_s9  ;;  %s2205_s28 = smov %s1662_s29 }
 0x3d1   :  { %18 = sbr.rel (!%p16_p12) target bundleno = 5 (0x5), region = 206 }

</bundles_post_ra>
